<compile_context>
chip_gen: v7x
topology: tpu7x:2x2x1
jax: 0.10.0
libtpu: 0.0.40
codegen_flags: <defaults>
</compile_context>

<pallas_src>
import jax
import jax.numpy as jnp
from jax.experimental import pallas as pl
from jax.experimental.pallas import tpu as pltpu

LANE = 128      # TPU lane width: intermediate/output feature dims padded to this
SUBLANE = 8     # f32 sublane granularity: batch padded/tiled to multiples of this


def _round_up(n, m):
    return (n + m - 1) // m * m


def _pad2d(a, rows, cols):
    r, c = a.shape
    return jnp.pad(a, ((0, rows - r), (0, cols - c)))


# ----------------------------- kernel ----------------------------------------

def _fused_chain_kernel(x_ref,
                        w13_f_ref, b13_f_ref, w2_f_ref, b2_f_ref,   # first block
                        w1_m_ref, b1_m_ref, w2_m_ref, b2_m_ref,      # middle block
                        w13_l_ref, b13_l_ref, w2_l_ref, b2_l_ref,    # last block
                        o_ref):
    Jp = w2_f_ref.shape[0]          # padded J (static, 128)
    f32 = jnp.float32
    bf16 = jnp.bfloat16

    x = x_ref[...].astype(bf16)     # bf16 MXU operands, f32 accumulation below

    # ---- first block: projected skip, layer1|layer3 merged into one matmul ----
    z = jnp.dot(x, w13_f_ref[...], preferred_element_type=f32) + b13_f_ref[...]
    y = jnp.maximum(z[:, :Jp], 0.0)            # relu(layer1(X))
    xp = z[:, Jp:]                             # layer3(X)
    y = jnp.dot(y.astype(bf16), w2_f_ref[...], preferred_element_type=f32) + b2_f_ref[...]
    h = jnp.maximum(y + xp, 0.0)               # relu(Y + layer3(X))

    # ---- middle block: identity skip ----
    y = jnp.dot(h.astype(bf16), w1_m_ref[...], preferred_element_type=f32) + b1_m_ref[...]
    y = jnp.maximum(y, 0.0)                    # relu(layer1(X))
    y = jnp.dot(y.astype(bf16), w2_m_ref[...], preferred_element_type=f32) + b2_m_ref[...]
    h = jnp.maximum(y + h, 0.0)                # relu(Y + X)

    # ---- last block: projected skip, layer1|layer3 merged into one matmul ----
    z = jnp.dot(h.astype(bf16), w13_l_ref[...], preferred_element_type=f32) + b13_l_ref[...]
    y = jnp.maximum(z[:, :Jp], 0.0)            # relu(layer1(X))
    xp = z[:, Jp:]                             # layer3(X)
    y = jnp.dot(y.astype(bf16), w2_l_ref[...], preferred_element_type=f32) + b2_l_ref[...]
    o_ref[...] = jnp.maximum(y + xp, 0.0)      # relu(Y + layer3(X))


# ----------------------------- wrapper ----------------------------------------

def residual_chain_forward(x, packed, J, ML, *, tile_b=1024):
    """Fused first -> middle -> last Residual chain in one pallas_call.

    Returns the padded, lane-dense result of shape (round_up(B, 8), 128);
    the logically valid region is [:B, :ML] and the padded lanes are exactly 0.
    """
    B, in_dim = x.shape
    assert in_dim == ML
    Jp, MLp = _round_up(J, LANE), _round_up(ML, LANE)

    # Batch padded only to the sublane granularity (8) -- never to a full tile.
    Bp = _round_up(B, SUBLANE)
    x_p = x if Bp == B else jnp.pad(x, ((0, Bp - B), (0, 0)))

    # Keep >= 2 grid steps when the batch allows it (megacore on v7x); large
    # batches keep the big tile for per-step-overhead amortization.
    tile_b = _round_up(max(tile_b, SUBLANE), SUBLANE)
    if Bp >= 2 * SUBLANE:
        tile_b = min(tile_b, _round_up(pl.cdiv(Bp, 2), SUBLANE))
    tile_b = min(tile_b, Bp)
    grid = (pl.cdiv(Bp, tile_b),)   # ragged last tile is masked by Pallas

    resident = lambda shape: pl.BlockSpec(shape, lambda i: (0, 0))  # VMEM-resident
    in_specs = [pl.BlockSpec((tile_b, ML), lambda i: (i, 0))] + \
               [resident(p.shape) for p in packed]
    out_specs = pl.BlockSpec((tile_b, MLp), lambda i: (i, 0))       # 128-lane dense

    out_p = pl.pallas_call(
        _fused_chain_kernel,
        out_shape=jax.ShapeDtypeStruct((Bp, MLp), jnp.float32),
        grid=grid,
        in_specs=in_specs,
        out_specs=out_specs,
        compiler_params=pltpu.CompilerParams(
            dimension_semantics=("parallel",),          # megacore sharding on v7x
            vmem_limit_bytes=32 * 1024 * 1024,          # covers v5e's 16 MiB default
        ),
    )(x_p, *packed)
    return out_p


# ------------------------- parameter construction -----------------------------

def linear_params(key, in_dim, out_dim):
    """Deterministic nn.Linear-style init: U(-1/sqrt(in), 1/sqrt(in))."""
    kw, kb = jax.random.split(key)
    bound = 1.0 / float(jnp.sqrt(jnp.float32(in_dim)))
    w = jax.random.uniform(kw, (out_dim, in_dim), jnp.float32, -bound, bound)
    b = jax.random.uniform(kb, (1, out_dim), jnp.float32, -bound, bound)
    return w.T, b                           # (in, out), (1, out)


def make_packed_chain_params(key, J, ML):
    """Padded + merged bf16 weights for the fused kernel, plus raw f32 params."""
    Jp, MLp = _round_up(J, LANE), _round_up(ML, LANE)
    kf, km, kl = jax.random.split(key, 3)
    bf16 = jnp.bfloat16

    # ---- first block: layer1 (ML->J), layer2 (J->J), layer3 (ML->J) ----
    k1, k2, k3 = jax.random.split(kf, 3)
    w1t, b1 = linear_params(k1, ML, J)
    w2t, b2 = linear_params(k2, J, J)
    w3t, b3 = linear_params(k3, ML, J)
    first_raw = (w1t, b1, w2t, b2, w3t, b3)
    # K dim of the first matmul is the TRUE ML (x is not lane-padded).
    w13_f = jnp.concatenate([_pad2d(w1t, ML, Jp), _pad2d(w3t, ML, Jp)], axis=1).astype(bf16)
    b13_f = jnp.concatenate([_pad2d(b1, 1, Jp), _pad2d(b3, 1, Jp)], axis=1)
    w2_f, b2_f = _pad2d(w2t, Jp, Jp).astype(bf16), _pad2d(b2, 1, Jp)

    # ---- middle block: layer1 (J->J), layer2 (J->J), identity skip ----
    k1, k2 = jax.random.split(km, 2)
    w1t_m, b1_m = linear_params(k1, J, J)
    w2t_m, b2_m = linear_params(k2, J, J)
    mid_raw = (w1t_m, b1_m, w2t_m, b2_m)
    w1_m, b1_mp = _pad2d(w1t_m, Jp, Jp).astype(bf16), _pad2d(b1_m, 1, Jp)
    w2_m, b2_mp = _pad2d(w2t_m, Jp, Jp).astype(bf16), _pad2d(b2_m, 1, Jp)

    # ---- last block: layer1 (J->J), layer2 (J->ML), layer3 (J->ML) ----
    k1, k2, k3 = jax.random.split(kl, 3)
    w1t_l, b1_l = linear_params(k1, J, J)
    w2t_l, b2_l = linear_params(k2, J, ML)
    w3t_l, b3_l = linear_params(k3, J, ML)
    last_raw = (w1t_l, b1_l, w2t_l, b2_l, w3t_l, b3_l)
    w13_l = jnp.concatenate([_pad2d(w1t_l, Jp, Jp), _pad2d(w3t_l, Jp, MLp)], axis=1).astype(bf16)
    b13_l = jnp.concatenate([_pad2d(b1_l, 1, Jp), _pad2d(b3_l, 1, MLp)], axis=1)
    w2_l, b2_lp = _pad2d(w2t_l, Jp, MLp).astype(bf16), _pad2d(b2_l, 1, MLp)

    packed = (w13_f, b13_f, w2_f, b2_f,
              w1_m, b1_mp, w2_m, b2_mp,
              w13_l, b13_l, w2_l, b2_lp)
    return packed, (first_raw, mid_raw, last_raw)


def residual_ref(x, params):
    """Pure-JAX f32 reference for one Residual block (unpadded, unmerged)."""
    if len(params) == 6:
        w1t, b1, w2t, b2, w3t, b3 = params
        y = jnp.maximum(x @ w1t + b1, 0.0)
        y = y @ w2t + b2
        xs = x @ w3t + b3
    else:
        w1t, b1, w2t, b2 = params
        y = jnp.maximum(x @ w1t + b1, 0.0)
        y = y @ w2t + b2
        xs = x
    return jnp.maximum(y + xs, 0.0)


# ------------------------------- main ------------------------------------------

if __name__ == "__main__":
    M, L = 8, 8
    ML = M * L          # 64
    J = 32
    B = 2               # small batch of waveform vectors (grid=(1,) at this size)

    key = jax.random.PRNGKey(0)
    kx, kp = jax.random.split(key)

    # input like X = torch.rand(ML), batched: (B, ML)
    x = jax.random.uniform(kx, (B, ML), jnp.float32)

    packed, (first_raw, mid_raw, last_raw) = make_packed_chain_params(kp, J, ML)

    # fused first -> middle -> last chain in a single pallas_call
    out_p = residual_chain_forward(x, packed, J, ML)
    out_p = jax.block_until_ready(out_p)

    # consumer-side slice of the padded (Bp, 128) lane-dense result
    out = out_p[:B, :ML]

    # pure-JAX f32 reference (per-block, unpadded)
    r = residual_ref(x, first_raw)
    r = residual_ref(r, mid_raw)
    r = residual_ref(r, last_raw)

    assert out.shape == (B, ML)
    # bf16 MXU operands with f32 accumulation -> relaxed tolerance vs f32 ref
    assert jnp.allclose(out, r, atol=3e-2, rtol=3e-2), \
        float(jnp.max(jnp.abs(out - r)))
    # padded lanes must be exactly zero (zero-padded weights/biases + relu)
    assert jnp.all(out_p[:B, ML:] == 0.0)
    print("KERNEL_OK")
</pallas_src>

<mosaic_0001>
module attributes {stable_mosaic.version = 11 : i64} {
  func.func @_fused_chain_kernel(%arg0: i32, %arg1: memref<8x64xf32, #tpu.memory_space<vmem>>, %arg2: memref<64x256xbf16, #tpu.memory_space<vmem>>, %arg3: memref<1x256xf32, #tpu.memory_space<vmem>>, %arg4: memref<128x128xbf16, #tpu.memory_space<vmem>>, %arg5: memref<1x128xf32, #tpu.memory_space<vmem>>, %arg6: memref<128x128xbf16, #tpu.memory_space<vmem>>, %arg7: memref<1x128xf32, #tpu.memory_space<vmem>>, %arg8: memref<128x128xbf16, #tpu.memory_space<vmem>>, %arg9: memref<1x128xf32, #tpu.memory_space<vmem>>, %arg10: memref<128x256xbf16, #tpu.memory_space<vmem>>, %arg11: memref<1x256xf32, #tpu.memory_space<vmem>>, %arg12: memref<128x128xbf16, #tpu.memory_space<vmem>>, %arg13: memref<1x128xf32, #tpu.memory_space<vmem>>, %arg14: memref<8x128xf32, #tpu.memory_space<vmem>>) attributes {dimension_semantics = [#tpu.dimension_semantics<parallel>], iteration_bounds = array<i64: 1>, scalar_prefetch = 0 : i64, scratch_operands = 0 : i64, tpu.core_type = #tpu.core_type<tc>, window_params = [{transform_indices = @transform_0, window_bounds = array<i64: 8, 64>}, {pipeline_mode = #tpu.pipeline_mode<synchronous>, transform_indices = @transform_1, window_bounds = array<i64: 64, 256>}, {pipeline_mode = #tpu.pipeline_mode<synchronous>, transform_indices = @transform_2, window_bounds = array<i64: 1, 256>}, {pipeline_mode = #tpu.pipeline_mode<synchronous>, transform_indices = @transform_3, window_bounds = array<i64: 128, 128>}, {pipeline_mode = #tpu.pipeline_mode<synchronous>, transform_indices = @transform_4, window_bounds = array<i64: 1, 128>}, {pipeline_mode = #tpu.pipeline_mode<synchronous>, transform_indices = @transform_5, window_bounds = array<i64: 128, 128>}, {pipeline_mode = #tpu.pipeline_mode<synchronous>, transform_indices = @transform_6, window_bounds = array<i64: 1, 128>}, {pipeline_mode = #tpu.pipeline_mode<synchronous>, transform_indices = @transform_7, window_bounds = array<i64: 128, 128>}, {pipeline_mode = #tpu.pipeline_mode<synchronous>, transform_indices = @transform_8, window_bounds = array<i64: 1, 128>}, {pipeline_mode = #tpu.pipeline_mode<synchronous>, transform_indices = @transform_9, window_bounds = array<i64: 128, 256>}, {pipeline_mode = #tpu.pipeline_mode<synchronous>, transform_indices = @transform_10, window_bounds = array<i64: 1, 256>}, {pipeline_mode = #tpu.pipeline_mode<synchronous>, transform_indices = @transform_11, window_bounds = array<i64: 128, 128>}, {pipeline_mode = #tpu.pipeline_mode<synchronous>, transform_indices = @transform_12, window_bounds = array<i64: 1, 128>}, {transform_indices = @transform_13, window_bounds = array<i64: 8, 128>}]} {
    %c0 = arith.constant 0 : index
    %c0_0 = arith.constant 0 : index
    %0 = vector.load %arg1[%c0, %c0_0] : memref<8x64xf32, #tpu.memory_space<vmem>>, vector<8x64xf32>
    %1 = arith.truncf %0 : vector<8x64xf32> to vector<8x64xbf16>
    %c0_1 = arith.constant 0 : index
    %c0_2 = arith.constant 0 : index
    %2 = vector.load %arg2[%c0_1, %c0_2] : memref<64x256xbf16, #tpu.memory_space<vmem>>, vector<64x256xbf16>
    %cst = arith.constant dense<0.000000e+00> : vector<8x256xf32>
    %3 = tpu.matmul %1, %2, %cst {dimension_numbers = #tpu.dot_dimension_numbers<[1], [0], [0], [1], [0, 0, 1, 1], [], []>} : vector<8x64xbf16>, vector<64x256xbf16>, vector<8x256xf32> -> vector<8x256xf32>
    %c0_3 = arith.constant 0 : index
    %c0_4 = arith.constant 0 : index
    %4 = vector.load %arg3[%c0_3, %c0_4] : memref<1x256xf32, #tpu.memory_space<vmem>>, vector<1x256xf32>
    %5 = vector.broadcast %4 : vector<1x256xf32> to vector<8x256xf32>
    %6 = arith.addf %3, %5 : vector<8x256xf32>
    %7 = vector.extract_strided_slice %6 {offsets = [0, 0], sizes = [8, 128], strides = [1, 1]} : vector<8x256xf32> to vector<8x128xf32>
    %cst_5 = arith.constant 0.000000e+00 : f32
    %8 = vector.broadcast %cst_5 : f32 to vector<8x128xf32>
    %9 = arith.maximumf %7, %8 : vector<8x128xf32>
    %10 = vector.extract_strided_slice %6 {offsets = [0, 128], sizes = [8, 128], strides = [1, 1]} : vector<8x256xf32> to vector<8x128xf32>
    %11 = arith.truncf %9 : vector<8x128xf32> to vector<8x128xbf16>
    %c0_6 = arith.constant 0 : index
    %c0_7 = arith.constant 0 : index
    %12 = vector.load %arg4[%c0_6, %c0_7] : memref<128x128xbf16, #tpu.memory_space<vmem>>, vector<128x128xbf16>
    %cst_8 = arith.constant dense<0.000000e+00> : vector<8x128xf32>
    %13 = tpu.matmul %11, %12, %cst_8 {dimension_numbers = #tpu.dot_dimension_numbers<[1], [0], [0], [1], [0, 0, 1, 1], [], []>} : vector<8x128xbf16>, vector<128x128xbf16>, vector<8x128xf32> -> vector<8x128xf32>
    %c0_9 = arith.constant 0 : index
    %c0_10 = arith.constant 0 : index
    %14 = vector.load %arg5[%c0_9, %c0_10] : memref<1x128xf32, #tpu.memory_space<vmem>>, vector<1x128xf32>
    %15 = vector.broadcast %14 : vector<1x128xf32> to vector<8x128xf32>
    %16 = arith.addf %13, %15 : vector<8x128xf32>
    %17 = arith.addf %16, %10 : vector<8x128xf32>
    %cst_11 = arith.constant 0.000000e+00 : f32
    %18 = vector.broadcast %cst_11 : f32 to vector<8x128xf32>
    %19 = arith.maximumf %17, %18 : vector<8x128xf32>
    %20 = arith.truncf %19 : vector<8x128xf32> to vector<8x128xbf16>
    %c0_12 = arith.constant 0 : index
    %c0_13 = arith.constant 0 : index
    %21 = vector.load %arg6[%c0_12, %c0_13] : memref<128x128xbf16, #tpu.memory_space<vmem>>, vector<128x128xbf16>
    %cst_14 = arith.constant dense<0.000000e+00> : vector<8x128xf32>
    %22 = tpu.matmul %20, %21, %cst_14 {dimension_numbers = #tpu.dot_dimension_numbers<[1], [0], [0], [1], [0, 0, 1, 1], [], []>} : vector<8x128xbf16>, vector<128x128xbf16>, vector<8x128xf32> -> vector<8x128xf32>
    %c0_15 = arith.constant 0 : index
    %c0_16 = arith.constant 0 : index
    %23 = vector.load %arg7[%c0_15, %c0_16] : memref<1x128xf32, #tpu.memory_space<vmem>>, vector<1x128xf32>
    %24 = vector.broadcast %23 : vector<1x128xf32> to vector<8x128xf32>
    %25 = arith.addf %22, %24 : vector<8x128xf32>
    %cst_17 = arith.constant 0.000000e+00 : f32
    %26 = vector.broadcast %cst_17 : f32 to vector<8x128xf32>
    %27 = arith.maximumf %25, %26 : vector<8x128xf32>
    %28 = arith.truncf %27 : vector<8x128xf32> to vector<8x128xbf16>
    %c0_18 = arith.constant 0 : index
    %c0_19 = arith.constant 0 : index
    %29 = vector.load %arg8[%c0_18, %c0_19] : memref<128x128xbf16, #tpu.memory_space<vmem>>, vector<128x128xbf16>
    %cst_20 = arith.constant dense<0.000000e+00> : vector<8x128xf32>
    %30 = tpu.matmul %28, %29, %cst_20 {dimension_numbers = #tpu.dot_dimension_numbers<[1], [0], [0], [1], [0, 0, 1, 1], [], []>} : vector<8x128xbf16>, vector<128x128xbf16>, vector<8x128xf32> -> vector<8x128xf32>
    %c0_21 = arith.constant 0 : index
    %c0_22 = arith.constant 0 : index
    %31 = vector.load %arg9[%c0_21, %c0_22] : memref<1x128xf32, #tpu.memory_space<vmem>>, vector<1x128xf32>
    %32 = vector.broadcast %31 : vector<1x128xf32> to vector<8x128xf32>
    %33 = arith.addf %30, %32 : vector<8x128xf32>
    %34 = arith.addf %33, %19 : vector<8x128xf32>
    %cst_23 = arith.constant 0.000000e+00 : f32
    %35 = vector.broadcast %cst_23 : f32 to vector<8x128xf32>
    %36 = arith.maximumf %34, %35 : vector<8x128xf32>
    %37 = arith.truncf %36 : vector<8x128xf32> to vector<8x128xbf16>
    %c0_24 = arith.constant 0 : index
    %c0_25 = arith.constant 0 : index
    %38 = vector.load %arg10[%c0_24, %c0_25] : memref<128x256xbf16, #tpu.memory_space<vmem>>, vector<128x256xbf16>
    %cst_26 = arith.constant dense<0.000000e+00> : vector<8x256xf32>
    %39 = tpu.matmul %37, %38, %cst_26 {dimension_numbers = #tpu.dot_dimension_numbers<[1], [0], [0], [1], [0, 0, 1, 1], [], []>} : vector<8x128xbf16>, vector<128x256xbf16>, vector<8x256xf32> -> vector<8x256xf32>
    %c0_27 = arith.constant 0 : index
    %c0_28 = arith.constant 0 : index
    %40 = vector.load %arg11[%c0_27, %c0_28] : memref<1x256xf32, #tpu.memory_space<vmem>>, vector<1x256xf32>
    %41 = vector.broadcast %40 : vector<1x256xf32> to vector<8x256xf32>
    %42 = arith.addf %39, %41 : vector<8x256xf32>
    %43 = vector.extract_strided_slice %42 {offsets = [0, 0], sizes = [8, 128], strides = [1, 1]} : vector<8x256xf32> to vector<8x128xf32>
    %cst_29 = arith.constant 0.000000e+00 : f32
    %44 = vector.broadcast %cst_29 : f32 to vector<8x128xf32>
    %45 = arith.maximumf %43, %44 : vector<8x128xf32>
    %46 = vector.extract_strided_slice %42 {offsets = [0, 128], sizes = [8, 128], strides = [1, 1]} : vector<8x256xf32> to vector<8x128xf32>
    %47 = arith.truncf %45 : vector<8x128xf32> to vector<8x128xbf16>
    %c0_30 = arith.constant 0 : index
    %c0_31 = arith.constant 0 : index
    %48 = vector.load %arg12[%c0_30, %c0_31] : memref<128x128xbf16, #tpu.memory_space<vmem>>, vector<128x128xbf16>
    %cst_32 = arith.constant dense<0.000000e+00> : vector<8x128xf32>
    %49 = tpu.matmul %47, %48, %cst_32 {dimension_numbers = #tpu.dot_dimension_numbers<[1], [0], [0], [1], [0, 0, 1, 1], [], []>} : vector<8x128xbf16>, vector<128x128xbf16>, vector<8x128xf32> -> vector<8x128xf32>
    %c0_33 = arith.constant 0 : index
    %c0_34 = arith.constant 0 : index
    %50 = vector.load %arg13[%c0_33, %c0_34] : memref<1x128xf32, #tpu.memory_space<vmem>>, vector<1x128xf32>
    %51 = vector.broadcast %50 : vector<1x128xf32> to vector<8x128xf32>
    %52 = arith.addf %49, %51 : vector<8x128xf32>
    %53 = arith.addf %52, %46 : vector<8x128xf32>
    %cst_35 = arith.constant 0.000000e+00 : f32
    %54 = vector.broadcast %cst_35 : f32 to vector<8x128xf32>
    %55 = arith.maximumf %53, %54 : vector<8x128xf32>
    %c0_36 = arith.constant 0 : index
    %c0_37 = arith.constant 0 : index
    %56 = vector.load %arg14[%c0_36, %c0_37] : memref<8x128xf32, #tpu.memory_space<vmem>>, vector<8x128xf32>
    tpu.vector_store %arg14[%c0_36, %c0_37], %55 {strides = array<i32>} : memref<8x128xf32, #tpu.memory_space<vmem>>, vector<8x128xf32>,
    return
  }
  func.func @transform_0(%arg0: i32) -> (i32, i32) {
    %c0_i32 = arith.constant 0 : i32
    %c0_i32_0 = arith.constant 0 : i32
    return %arg0, %c0_i32 : i32, i32
  }
  func.func @transform_1(%arg0: i32) -> (i32, i32) {
    %c0_i32 = arith.constant 0 : i32
    %c0_i32_0 = arith.constant 0 : i32
    %c0_i32_1 = arith.constant 0 : i32
    return %c0_i32, %c0_i32_0 : i32, i32
  }
  func.func @transform_2(%arg0: i32) -> (i32, i32) {
    %c0_i32 = arith.constant 0 : i32
    %c0_i32_0 = arith.constant 0 : i32
    %c0_i32_1 = arith.constant 0 : i32
    return %c0_i32, %c0_i32_0 : i32, i32
  }
  func.func @transform_3(%arg0: i32) -> (i32, i32) {
    %c0_i32 = arith.constant 0 : i32
    %c0_i32_0 = arith.constant 0 : i32
    %c0_i32_1 = arith.constant 0 : i32
    return %c0_i32, %c0_i32_0 : i32, i32
  }
  func.func @transform_4(%arg0: i32) -> (i32, i32) {
    %c0_i32 = arith.constant 0 : i32
    %c0_i32_0 = arith.constant 0 : i32
    %c0_i32_1 = arith.constant 0 : i32
    return %c0_i32, %c0_i32_0 : i32, i32
  }
  func.func @transform_5(%arg0: i32) -> (i32, i32) {
    %c0_i32 = arith.constant 0 : i32
    %c0_i32_0 = arith.constant 0 : i32
    %c0_i32_1 = arith.constant 0 : i32
    return %c0_i32, %c0_i32_0 : i32, i32
  }
  func.func @transform_6(%arg0: i32) -> (i32, i32) {
    %c0_i32 = arith.constant 0 : i32
    %c0_i32_0 = arith.constant 0 : i32
    %c0_i32_1 = arith.constant 0 : i32
    return %c0_i32, %c0_i32_0 : i32, i32
  }
  func.func @transform_7(%arg0: i32) -> (i32, i32) {
    %c0_i32 = arith.constant 0 : i32
    %c0_i32_0 = arith.constant 0 : i32
    %c0_i32_1 = arith.constant 0 : i32
    return %c0_i32, %c0_i32_0 : i32, i32
  }
  func.func @transform_8(%arg0: i32) -> (i32, i32) {
    %c0_i32 = arith.constant 0 : i32
    %c0_i32_0 = arith.constant 0 : i32
    %c0_i32_1 = arith.constant 0 : i32
    return %c0_i32, %c0_i32_0 : i32, i32
  }
  func.func @transform_9(%arg0: i32) -> (i32, i32) {
    %c0_i32 = arith.constant 0 : i32
    %c0_i32_0 = arith.constant 0 : i32
    %c0_i32_1 = arith.constant 0 : i32
    return %c0_i32, %c0_i32_0 : i32, i32
  }
  func.func @transform_10(%arg0: i32) -> (i32, i32) {
    %c0_i32 = arith.constant 0 : i32
    %c0_i32_0 = arith.constant 0 : i32
    %c0_i32_1 = arith.constant 0 : i32
    return %c0_i32, %c0_i32_0 : i32, i32
  }
  func.func @transform_11(%arg0: i32) -> (i32, i32) {
    %c0_i32 = arith.constant 0 : i32
    %c0_i32_0 = arith.constant 0 : i32
    %c0_i32_1 = arith.constant 0 : i32
    return %c0_i32, %c0_i32_0 : i32, i32
  }
  func.func @transform_12(%arg0: i32) -> (i32, i32) {
    %c0_i32 = arith.constant 0 : i32
    %c0_i32_0 = arith.constant 0 : i32
    %c0_i32_1 = arith.constant 0 : i32
    return %c0_i32, %c0_i32_0 : i32, i32
  }
  func.func @transform_13(%arg0: i32) -> (i32, i32) {
    %c0_i32 = arith.constant 0 : i32
    %c0_i32_0 = arith.constant 0 : i32
    return %arg0, %c0_i32 : i32, i32
  }
}

</mosaic_0001>

<bundles_post_ra>
// kernel: tpu_custom_call.1
= control target key start
LH: loop header
LB: loop body
LE: loop exit
PB: predicated region body
PF: predicated region fallthrough
CT: control target
= control target key end

     0   :  { %18 = vsyncpa [#allocation3], 0  ;;  %s1594_s0 = inlined_call_operand.hbm [shape: f32[8,64], index: 0, kind: input, shape index: {}]   ;;  %s1595_s1 = inlined_call_operand.hbm [shape: bf16[64,256], index: 1, kind: input, shape index: {}]   ;;  %s1596_s2 = inlined_call_operand.vmem [shape: f32[1,256], index: 2, kind: input, shape index: {}]   ;;  %s1597_s3 = inlined_call_operand.hbm [shape: bf16[128,128], index: 3, kind: input, shape index: {}]   ;;  %s1598_s4 = inlined_call_operand.vmem [shape: f32[1,128], index: 4, kind: input, shape index: {}]   ;;  %s1599_s5 = inlined_call_operand.hbm [shape: bf16[128,128], index: 5, kind: input, shape index: {}]   ;;  %s1600_s6 = inlined_call_operand.vmem [shape: f32[1,128], index: 6, kind: input, shape index: {}]   ;;  %s1601_s7 = inlined_call_operand.hbm [shape: bf16[128,128], index: 7, kind: input, shape index: {}]   ;;  %s1602_s8 = inlined_call_operand.vmem [shape: f32[1,128], index: 8, kind: input, shape index: {}]   ;;  %s1603_s9 = inlined_call_operand.hbm [shape: bf16[128,256], index: 9, kind: input, shape index: {}]   ;;  %s1604_s10 = inlined_call_operand.vmem [shape: f32[1,256], index: 10, kind: input, shape index: {}]   ;;  %s1605_s11 = inlined_call_operand.hbm [shape: bf16[128,128], index: 11, kind: input, shape index: {}]   ;;  %s1606_s12 = inlined_call_operand.vmem [shape: f32[1,128], index: 12, kind: input, shape index: {}]   ;;  %s1607_s13 = inlined_call_operand.hbm [shape: f32[8,128], index: 13, kind: output, shape index: {}]  }
   0x1   :  { %19 = vsyncpa [#allocation6], 0 }
   0x2   :  { %20 = vsyncpa [#allocation9], 0 }
   0x3   :  { %21 = vsyncpa [#allocation12], 0 }
   0x4   :  { %22 = vsyncpa [#allocation4], 0  ;;  %s1318_s25 = smov [#allocation5]   ;;  %s1132_s29 = scalar_lea.hbm %s1595_s1, 1024 }
   0x5   :  { %s38_s26 = sshll.u32 %s1318_s25, 4  ;;  %p1133_p0 = scmp.ne.s32.totalorder %s1595_s1, %s1132_s29  ;;  %s39_s26 = int_to_ptr.vmem [resolvable:$true] %s38_s26 }
   0x6   :  { %p1136_p1 = scmp.lt.u32.totalorder %s1132_s29, %s1595_s1 }
   0x8   :  { %p1138_p2 = pnand %p1136_p1, %p1133_p0 }
   0xa   :  { %1141 = shalt.err (!%p1138_p2)
}
   0xb   :  { %s1142_s17 = scalar_lea.vmem %s39_s26, 1024  ;;  %p1147_p4 = scmp.lt.s32.totalorder %s39_s26, %s39_s26 }
   0xc   :  { %p1143_p3 = scmp.ne.s32.totalorder %s39_s26, %s1142_s17  ;;  %p1148_p5 = scmp.lt.s32.totalorder %s1142_s17, %s1142_s17 }
   0xe   :  { %p1149_p6 = por %p1148_p5, %p1147_p4 }
  0x10   :  { %p1150_p7 = pnand %p1149_p6, %p1143_p3 }
  0x12   :  { %1153 = shalt.err (!%p1150_p7)
}
  0x13   :  { %s1319_s18 = smov 128   ;;  %s1320_s19 = smov 8  }
  0x14   :  { %44 = dma.hbm_to_vmem [thread:$0]  %s1595_s1, 1024, %s39_s26, [#allocation6], %s1319_s18, %s1319_s18, %s1320_s19  }
  0x15   :  { %s1321_s22 = smov [#allocation8]   ;;  %s1322_s24 = smov [#allocation11]  }
  0x16   :  { %s66_s23 = sshll.u32 %s1321_s22, 4  ;;  %s94_s25 = sshll.u32 %s1322_s24, 4  ;;  %s67_s23 = int_to_ptr.vmem [resolvable:$true] %s66_s23  ;;  %s95_s25 = int_to_ptr.vmem [resolvable:$true] %s94_s25 }
  0x17   :  { %s1154_s29 = scalar_lea.hbm %s1599_s5, 1024 }
  0x18   :  { %p1155_p8 = scmp.ne.s32.totalorder %s1599_s5, %s1154_s29  ;;  %p1158_p9 = scmp.lt.u32.totalorder %s1154_s29, %s1599_s5 }
  0x1a   :  { %p1160_p10 = pnand %p1158_p9, %p1155_p8 }
  0x1c   :  { %1163 = shalt.err (!%p1160_p10)
}
  0x1d   :  { %s1164_s1 = scalar_lea.vmem %s67_s23, 1024  ;;  %p1169_p12 = scmp.lt.s32.totalorder %s67_s23, %s67_s23 }
  0x1e   :  { %p1165_p11 = scmp.ne.s32.totalorder %s67_s23, %s1164_s1  ;;  %p1170_p13 = scmp.lt.s32.totalorder %s1164_s1, %s1164_s1 }
  0x20   :  { %p1171_p0 = por %p1170_p13, %p1169_p12 }
  0x22   :  { %p1172_p1 = pnand %p1171_p0, %p1165_p11 }
  0x24   :  { %1175 = shalt.err (!%p1172_p1)
}
  0x25   :  { %s1323_s26 = smov 64   ;;  %s1324_s17 = smov 4  }
  0x26   :  { %72 = dma.hbm_to_vmem [thread:$0]  %s1599_s5, 1024, %s67_s23, [#allocation9], %s1323_s26, %s1323_s26, %s1324_s17  }
  0x27   :  { %s1176_s27 = scalar_lea.hbm %s1603_s9, 2048 }
  0x28   :  { %p1177_p2 = scmp.ne.s32.totalorder %s1603_s9, %s1176_s27  ;;  %p1180_p3 = scmp.lt.u32.totalorder %s1176_s27, %s1603_s9 }
  0x2a   :  { %p1182_p4 = pnand %p1180_p3, %p1177_p2 }
  0x2c   :  { %1185 = shalt.err (!%p1182_p4)
}
  0x2d   :  { %s1186_s15 = scalar_lea.vmem %s95_s25, 2048  ;;  %p1191_p6 = scmp.lt.s32.totalorder %s95_s25, %s95_s25 }
  0x2e   :  { %p1187_p5 = scmp.ne.s32.totalorder %s95_s25, %s1186_s15  ;;  %p1192_p7 = scmp.lt.s32.totalorder %s1186_s15, %s1186_s15 }
  0x30   :  { %p1193_p8 = por %p1192_p7, %p1191_p6 }
  0x32   :  { %p1194_p9 = pnand %p1193_p8, %p1187_p5 }
  0x34   :  { %1197 = shalt.err (!%p1194_p9)
}
  0x35   :  { %100 = dma.hbm_to_vmem [thread:$0]  %s1603_s9, 2048, %s95_s25, [#allocation12], %s1319_s18, %s1319_s18, %s1320_s19  }
  0x36   :  { %s1325_s16 = smov [#allocation2]   ;;  %s1326_s20 = smov [#allocation7]  }
  0x37   :  { %s29_s1 = sshll.u32 %s1325_s16, 4  ;;  %s52_s21 = sshll.u32 %s1326_s20, 4  ;;  %s30_s1 = int_to_ptr.vmem [resolvable:$true] %s29_s1  ;;  %s53_s21 = int_to_ptr.vmem [resolvable:$true] %s52_s21 }
  0x38   :  { %s1198_s27 = scalar_lea.hbm %s1594_s0, 128 }
  0x39   :  { %p1199_p10 = scmp.ne.s32.totalorder %s1594_s0, %s1198_s27  ;;  %p1202_p11 = scmp.lt.u32.totalorder %s1198_s27, %s1594_s0 }
  0x3b   :  { %p1204_p12 = pnand %p1202_p11, %p1199_p10 }
  0x3d   :  { %1207 = shalt.err (!%p1204_p12)
}
  0x3e   :  { %s1208_s9 = scalar_lea.vmem %s30_s1, 128  ;;  %p1213_p0 = scmp.lt.s32.totalorder %s30_s1, %s30_s1 }
  0x3f   :  { %p1209_p13 = scmp.ne.s32.totalorder %s30_s1, %s1208_s9  ;;  %p1214_p1 = scmp.lt.s32.totalorder %s1208_s9, %s1208_s9 }
  0x41   :  { %p1215_p2 = por %p1214_p1, %p1213_p0 }
  0x43   :  { %p1216_p3 = pnand %p1215_p2, %p1209_p13 }
  0x45   :  { %1219 = shalt.err (!%p1216_p3)
}
  0x46   :  { %32 = dma.hbm_to_vmem [thread:$0]  %s1594_s0, 128, %s30_s1, [#allocation3]  }
  0x47   :  { %s1220_s5 = scalar_lea.hbm %s1597_s3, 1024 }
  0x48   :  { %p1221_p4 = scmp.ne.s32.totalorder %s1597_s3, %s1220_s5  ;;  %p1224_p5 = scmp.lt.u32.totalorder %s1220_s5, %s1597_s3 }
  0x4a   :  { %p1226_p6 = pnand %p1224_p5, %p1221_p4 }
  0x4c   :  { %1229 = shalt.err (!%p1226_p6)
}
  0x4d   :  { %s1230_s24 = scalar_lea.vmem %s53_s21, 1024  ;;  %p1235_p8 = scmp.lt.s32.totalorder %s53_s21, %s53_s21 }
  0x4e   :  { %p1231_p7 = scmp.ne.s32.totalorder %s53_s21, %s1230_s24  ;;  %p1236_p9 = scmp.lt.s32.totalorder %s1230_s24, %s1230_s24 }
  0x50   :  { %p1237_p10 = por %p1236_p9, %p1235_p8 }
  0x52   :  { %p1238_p11 = pnand %p1237_p10, %p1231_p7 }
  0x54   :  { %1241 = shalt.err (!%p1238_p11)
}
  0x55   :  { %58 = dma.hbm_to_vmem [thread:$0]  %s1597_s3, 1024, %s53_s21, [#allocation6], %s1323_s26, %s1323_s26, %s1324_s17  }
  0x56   :  { %s1327_s27 = smov [#allocation10]   ;;  %s1328_s29 = smov [#allocation13]  }
  0x57   :  { %s80_s28 = sshll.u32 %s1327_s27, 4  ;;  %s108_s30 = sshll.u32 %s1328_s29, 4  ;;  %s81_s28 = int_to_ptr.vmem [resolvable:$true] %s80_s28  ;;  %s109_s30 = int_to_ptr.vmem [resolvable:$true] %s108_s30 }
  0x58   :  { %s1242_s18 = scalar_lea.hbm %s1601_s7, 1024 }
  0x59   :  { %p1243_p12 = scmp.ne.s32.totalorder %s1601_s7, %s1242_s18  ;;  %p1246_p13 = scmp.lt.u32.totalorder %s1242_s18, %s1601_s7 }
  0x5b   :  { %p1248_p0 = pnand %p1246_p13, %p1243_p12 }
  0x5d   :  { %1251 = shalt.err (!%p1248_p0)
}
  0x5e   :  { %s1252_s3 = scalar_lea.vmem %s81_s28, 1024  ;;  %p1257_p2 = scmp.lt.s32.totalorder %s81_s28, %s81_s28 }
  0x5f   :  { %p1253_p1 = scmp.ne.s32.totalorder %s81_s28, %s1252_s3  ;;  %p1258_p3 = scmp.lt.s32.totalorder %s1252_s3, %s1252_s3 }
  0x61   :  { %p1259_p4 = por %p1258_p3, %p1257_p2 }
  0x63   :  { %p1260_p5 = pnand %p1259_p4, %p1253_p1 }
  0x65   :  { %1263 = shalt.err (!%p1260_p5)
}
  0x66   :  { %86 = dma.hbm_to_vmem [thread:$0]  %s1601_s7, 1024, %s81_s28, [#allocation9], %s1323_s26, %s1323_s26, %s1324_s17  }
  0x67   :  { %s1264_s22 = scalar_lea.hbm %s1605_s11, 1024 }
  0x68   :  { %p1265_p6 = scmp.ne.s32.totalorder %s1605_s11, %s1264_s22  ;;  %p1268_p7 = scmp.lt.u32.totalorder %s1264_s22, %s1605_s11 }
  0x6a   :  { %p1270_p8 = pnand %p1268_p7, %p1265_p6 }
  0x6c   :  { %1273 = shalt.err (!%p1270_p8)
}
  0x6d   :  { %s1274_s29 = scalar_lea.vmem %s109_s30, 1024  ;;  %p1279_p10 = scmp.lt.s32.totalorder %s109_s30, %s109_s30 }
  0x6e   :  { %p1275_p9 = scmp.ne.s32.totalorder %s109_s30, %s1274_s29  ;;  %p1280_p11 = scmp.lt.s32.totalorder %s1274_s29, %s1274_s29 }
  0x70   :  { %p1281_p12 = por %p1280_p11, %p1279_p10 }
  0x72   :  { %p1282_p13 = pnand %p1281_p12, %p1275_p9 }
  0x74   :  { %1285 = shalt.err (!%p1282_p13)
}
  0x75   :  { %114 = dma.hbm_to_vmem [thread:$0]  %s1605_s11, 1024, %s109_s30, [#allocation12], %s1323_s26, %s1323_s26, %s1324_s17  }
  0x76   :  { %1308 = dma.done.wait [#allocation3], 128  }
  0x77   :  { %1309 = vsyncadd [#allocation3], 4294967168 }
  0x78   :  { %1310 = dma.done.wait [#allocation6], 2048  }
  0x79   :  { %1311 = vsyncadd [#allocation6], 4294965248 }
  0x7a   :  { %1312 = dma.done.wait [#allocation9], 2048  }
  0x7b   :  { %1313 = vsyncadd [#allocation9], 4294965248 }
  0x7c   :  { %1314 = dma.done.wait [#allocation12], 3072  }
  0x7d   :  { %1315 = vsyncadd [#allocation12], 4294964224  ;;  %v1329_v0 = vmov 0   ;;  %v1330_v1 = vmov 0.0   ;;  %v1064_v2 = vld [vmem:[#allocation5 + $0x4] ss:$8 sps:$4 sm:$0xff]   ;;  %v151_v26 = vlaneseq }
  0x7e   :  { %237 = vmatprep.mubr.bf16.mxu0 %v1329_v0  ;;  %969 = vmatprep.subr.bf16.mxu1 %v1330_v1  ;;  %v1066_v3 = vld [vmem:[#allocation5] ss:$8 sps:$4 sm:$0xff]   ;;  %v1067_v4 = vld [vmem:[#allocation5 + $0x14] ss:$8 sps:$4 sm:$0xff]   ;;  %v1069_v5 = vld [vmem:[#allocation5 + $0x10] ss:$8 sps:$4 sm:$0xff]  }
  0x7f   :  { %205 = vmatprep.subr.bf16.mxu0 %v1064_v2  ;;  %v1070_v6 = vld [vmem:[#allocation5 + $0x24] ss:$8 sps:$4 sm:$0xff]   ;;  %v1072_v7 = vld [vmem:[#allocation5 + $0x20] ss:$8 sps:$4 sm:$0xff]   ;;  %v1073_v9 = vld [vmem:[#allocation5 + $0x34] ss:$8 sps:$4 sm:$0xff]  }
  0x80   :  { %206 = vmatpush1.bf16.msra.mxu0 %v1066_v3  ;;  %v1076_v8 = vld [vmem:[#allocation7] sm:$0xff]   ;;  %v1077_v10 = vld [vmem:[#allocation7 + $0x8] sm:$0xff]   ;;  %v1075_v11 = vld [vmem:[#allocation5 + $0x30] ss:$8 sps:$4 sm:$0xff]   ;;  %vm201_vm0 = vcmask 523264   ;;  %vm1331_vm1 = vmmov 0  }
  0x81   :  { %207 = vmatprep.subr.bf16.mxu0 %v1067_v4  ;;  %970 = vmatpush3.bf16.msra.mxu1 %v1076_v8  ;;  %v139_v12 = vld [vmem:[#allocation2] sm:$0xff]  ;;  %v1078_v13 = vld [vmem:[#allocation7 + $0x10] sm:$0xff]   ;;  %v1080_v16 = vld [vmem:[#allocation7 + $0x20] sm:$0xff]   ;;  %v1526_v27 = vshrl.u32 %v151_v26, 7 }
  0x82   :  { %971 = vmatprep.subr.bf16.mxu1 %v1330_v1  ;;  %v140_v14 = vpack.c.bf16 %v139_v12, %v139_v12  ;;  %v1079_v15 = vld [vmem:[#allocation7 + $0x18] sm:$0xff]   ;;  %v1081_v17 = vld [vmem:[#allocation7 + $0x28] sm:$0xff]   ;;  %v1082_v18 = vld [vmem:[#allocation7 + $0x30] sm:$0xff]   ;;  %985 = vmatprep.mubr.msk.bf16.mxu1 %vm1331_vm1, %v1330_v1 }
  0x83   :  { %v1083_v19 = vld [vmem:[#allocation7 + $0x38] sm:$0xff]   ;;  %v1084_v20 = vld [vmem:[#allocation8] sm:$0xff]   ;;  %v1085_v21 = vld [vmem:[#allocation8 + $0x8] sm:$0xff]   ;;  %v153_v28 = vsub.s32 0, %v1526_v27  ;;  %v157_v46 = vsub.s32 1, %v1526_v27 }
  0x84   :  { %208 = vmatpush1.bf16.msra.mxu0 %v1069_v5  ;;  %v1086_v22 = vld [vmem:[#allocation8 + $0x10] sm:$0xff]   ;;  %v1087_v23 = vld [vmem:[#allocation8 + $0x18] sm:$0xff]   ;;  %v1088_v24 = vld [vmem:[#allocation8 + $0x20] sm:$0xff]  }
  0x85   :  { %209 = vmatprep.subr.bf16.mxu0 %v1070_v6  ;;  %972 = vmatpush3.bf16.msra.mxu1 %v1077_v10  ;;  %v1089_v25 = vld [vmem:[#allocation8 + $0x28] sm:$0xff]   ;;  %v149_v29 = vld [vmem:[%s1596_s2] sm:$0x3]  ;;  %v1090_v38 = vld [vmem:[#allocation8 + $0x30] sm:$0xff]  }
  0x86   :  { %973 = vmatprep.subr.bf16.mxu1 %v1330_v1  ;;  %v154_v30 = vrot.slane %v149_v29, %v153_v28  ;;  %v1091_v39 = vld [vmem:[#allocation8 + $0x38] sm:$0xff]   ;;  %v1092_v40 = vld [vmem:[#allocation10] sm:$0xff]   ;;  %v1093_v41 = vld [vmem:[#allocation10 + $0x8] sm:$0xff]   ;;  %v158_v47 = vrot.slane %v149_v29, %v157_v46 }
  0x87   :  { %v1094_v42 = vld [vmem:[#allocation10 + $0x10] sm:$0xff]   ;;  %v1095_v43 = vld [vmem:[#allocation10 + $0x18] sm:$0xff]   ;;  %v1096_v44 = vld [vmem:[#allocation10 + $0x20] sm:$0xff]  }
  0x88   :  { %210 = vmatpush1.bf16.msra.mxu0 %v1072_v7  ;;  %v1097_v45 = vld [vmem:[#allocation10 + $0x28] sm:$0xff]   ;;  %v881_v48 = vld [vmem:[%s1598_s4] ss:$0 sm:$0xff]  ;;  %v1098_v58 = vld [vmem:[#allocation10 + $0x30] sm:$0xff]  }
  0x89   :  { %211 = vmatprep.subr.bf16.mxu0 %v1073_v9  ;;  %974 = vmatpush3.bf16.msra.mxu1 %v1078_v13  ;;  %v1099_v59 = vld [vmem:[#allocation10 + $0x38] sm:$0xff]   ;;  %v1100_v60 = vld [vmem:[#allocation11] ss:$8 sps:$4 sm:$0xff]   ;;  %v1102_v61 = vld [vmem:[#allocation11 + $0x4] ss:$8 sps:$4 sm:$0xff]  }
  0x8a   :  { %975 = vmatprep.subr.bf16.mxu1 %v1330_v1  ;;  %v1105_v62 = vld [vmem:[#allocation11 + $0x14] ss:$8 sps:$4 sm:$0xff]   ;;  %v1103_v63 = vld [vmem:[#allocation11 + $0x10] ss:$8 sps:$4 sm:$0xff]   ;;  %v1108_v2 = vld [vmem:[#allocation11 + $0x24] ss:$8 sps:$4 sm:$0xff]  }
  0x8b   :  { %v1106_v3 = vld [vmem:[#allocation11 + $0x20] ss:$8 sps:$4 sm:$0xff]   ;;  %v1109_v4 = vld [vmem:[#allocation11 + $0x30] ss:$8 sps:$4 sm:$0xff]   ;;  %v1114_v5 = vld [vmem:[#allocation11 + $0x44] ss:$8 sps:$4 sm:$0xff]  }
  0x8c   :  { %212 = vmatpush1.bf16.msra.mxu0 %v1075_v11  ;;  %v1112_v6 = vld [vmem:[#allocation11 + $0x40] ss:$8 sps:$4 sm:$0xff]   ;;  %v1117_v7 = vld [vmem:[#allocation11 + $0x54] ss:$8 sps:$4 sm:$0xff]   ;;  %v1115_v8 = vld [vmem:[#allocation11 + $0x50] ss:$8 sps:$4 sm:$0xff]  }
  0x8d   :  { %989 = vmatprep.subr.bf16.mxu0 %v1330_v1  ;;  %976 = vmatpush3.bf16.msra.mxu1 %v1079_v15  ;;  %v890_v9 = vld [vmem:[%s1600_s6] ss:$0 sm:$0xff]  ;;  %v1129_v26 = vld [vmem:[#allocation13 + $0x28] sm:$0xff]  }
  0x8e   :  { %977 = vmatprep.subr.bf16.mxu1 %v1330_v1  ;;  %v899_v29 = vld [vmem:[%s1602_s8] ss:$0 sm:$0xff] }
  0x8f   :  { %880 = vmatmul.mubr.msk.bf16.vlgmr.msra.gmra.mrb[0].mxu0 %vm201_vm0, %v140_v14 }
  0x90   :  { %1005 = vmatprep.mubr.msk.bf16.mxu0 %vm1331_vm1, %v1330_v1  ;;  %990 = vmatpush3.bf16.msra.mxu0 %v1084_v20  ;;  %v1121_v20 = vld [vmem:[#allocation11 + $0x70] ss:$8 sps:$4 sm:$0xff]  }
  0x91   :  { %978 = vmatpush3.bf16.msra.mxu1 %v1080_v16  ;;  %991 = vmatprep.subr.bf16.mxu0 %v1330_v1 }
  0x92   :  { %979 = vmatprep.subr.bf16.mxu1 %v1330_v1 }
  0x94   :  { %992 = vmatpush3.bf16.msra.mxu0 %v1085_v21  ;;  %v1124_v21 = vld [vmem:[#allocation13] sm:$0xff]  }
  0x95   :  { %980 = vmatpush3.bf16.msra.mxu1 %v1081_v17  ;;  %993 = vmatprep.subr.bf16.mxu0 %v1330_v1  ;;  %v1120_v17 = vld [vmem:[#allocation11 + $0x64] ss:$8 sps:$4 sm:$0xff]  }
  0x96   :  { %981 = vmatprep.subr.bf16.mxu1 %v1330_v1 }
  0x98   :  { %994 = vmatpush3.bf16.msra.mxu0 %v1086_v22  ;;  %v1125_v22 = vld [vmem:[#allocation13 + $0x8] sm:$0xff]  }
  0x99   :  { %982 = vmatpush3.bf16.msra.mxu1 %v1082_v18  ;;  %995 = vmatprep.subr.bf16.mxu0 %v1330_v1  ;;  %v1118_v18 = vld [vmem:[#allocation11 + $0x60] ss:$8 sps:$4 sm:$0xff]  }
  0x9a   :  { %983 = vmatprep.subr.bf16.mxu1 %v1330_v1 }
  0x9c   :  { %996 = vmatpush3.bf16.msra.mxu0 %v1087_v23  ;;  %v1126_v23 = vld [vmem:[#allocation13 + $0x10] sm:$0xff]  }
  0x9d   :  { %984 = vmatpush3.bf16.msra.mxu1 %v1083_v19  ;;  %997 = vmatprep.subr.bf16.mxu0 %v1330_v1  ;;  %v1123_v19 = vld [vmem:[#allocation11 + $0x74] ss:$8 sps:$4 sm:$0xff]  }
  0x9e   :  { %1009 = vmatprep.subr.bf16.mxu1 %v1330_v1 }
  0xa0   :  { %998 = vmatpush3.bf16.msra.mxu0 %v1088_v24  ;;  %v1127_v24 = vld [vmem:[#allocation13 + $0x18] sm:$0xff]  }
  0xa1   :  { %999 = vmatprep.subr.bf16.mxu0 %v1330_v1 }
  0xa4   :  { %1000 = vmatpush3.bf16.msra.mxu0 %v1089_v25  ;;  %v1128_v25 = vld [vmem:[#allocation13 + $0x20] sm:$0xff]  }
  0xa5   :  { %1001 = vmatprep.subr.bf16.mxu0 %v1330_v1 }
  0xa8   :  { %1002 = vmatpush3.bf16.msra.mxu0 %v1090_v38  ;;  %v1130_v38 = vld [vmem:[#allocation13 + $0x30] sm:$0xff]  }
  0xa9   :  { %1003 = vmatprep.subr.bf16.mxu0 %v1330_v1 }
  0xac   :  { %1004 = vmatpush3.bf16.msra.mxu0 %v1091_v39  ;;  %v1131_v39 = vld [vmem:[#allocation13 + $0x38] sm:$0xff]  }
  0xad   :  { %697 = vmatprep.subr.bf16.mxu0 %v1102_v61 }
 0x162   :  { %v239_v31 = vpop.f32.mrb[0].mxu0 }
 0x163   :  { %v240_v32 = vadd.f32 %v239_v31, %v154_v30  ;;  %v241_v33 = vpop.f32.mrb[1].mxu0 }
 0x164   :  { %v243_v34 = vpop.f32.mrb[2].mxu0  ;;  %v242_v50 = vadd.f32 %v241_v33, %v158_v47 }
 0x165   :  { %v246_v35 = vmax.f32 %v240_v32, 0.0  ;;  %v244_v36 = vpop.f32.mrb[3].mxu0 }
 0x167   :  { %v247_v37 = vpack.c.bf16 %v246_v35, %v246_v35 }
 0x169   :  { %986 = vmatmul.mubr.bf16.vlgmr.msra.gmra.mrb[0].mxu1 %v247_v37 }
 0x16a   :  { %1025 = vmatprep.mubr.msk.bf16.mxu1 %vm1331_vm1, %v1330_v1  ;;  %1010 = vmatpush3.bf16.msra.mxu1 %v1092_v40  ;;  %v605_v40 = vld [vmem:[%s1604_s10] sm:$0x3]  ;;  %s1332_s10 = smov [#allocation14]  }
 0x16b   :  { %1011 = vmatprep.subr.bf16.mxu1 %v1330_v1  ;;  %s860_s25 = sshll.u32 %s1332_s10, 4  ;;  %s861_s25 = int_to_ptr.vmem [resolvable:$true] %s860_s25 }
 0x16c   :  { %s1286_s15 = scalar_lea.vmem %s861_s25, 128  ;;  %p1291_p1 = scmp.lt.s32.totalorder %s861_s25, %s861_s25 }
 0x16d   :  { %p1287_p0 = scmp.ne.s32.totalorder %s861_s25, %s1286_s15  ;;  %p1292_p2 = scmp.lt.s32.totalorder %s1286_s15, %s1286_s15 }
 0x16e   :  { %1012 = vmatpush3.bf16.msra.mxu1 %v1093_v41  ;;  %v610_v41 = vrot.slane %v605_v40, %v153_v28 }
 0x16f   :  { %1013 = vmatprep.subr.bf16.mxu1 %v1330_v1  ;;  %p1293_p3 = por %p1292_p2, %p1291_p1 }
 0x171   :  { %p1294_p4 = pnand %p1293_p3, %p1287_p0 }
 0x172   :  { %1014 = vmatpush3.bf16.msra.mxu1 %v1094_v42 }
 0x173   :  { %1015 = vmatprep.subr.bf16.mxu1 %v1330_v1 }
 0x176   :  { %1016 = vmatpush3.bf16.msra.mxu1 %v1095_v43 }
 0x177   :  { %1017 = vmatprep.subr.bf16.mxu1 %v1330_v1 }
 0x17a   :  { %1018 = vmatpush3.bf16.msra.mxu1 %v1096_v44 }
 0x17b   :  { %1019 = vmatprep.subr.bf16.mxu1 %v1330_v1 }
 0x17e   :  { %1020 = vmatpush3.bf16.msra.mxu1 %v1097_v45 }
 0x17f   :  { %1021 = vmatprep.subr.bf16.mxu1 %v1330_v1 }
 0x182   :  { %1022 = vmatpush3.bf16.msra.mxu1 %v1098_v58 }
 0x183   :  { %1023 = vmatprep.subr.bf16.mxu1 %v1330_v1 }
 0x186   :  { %1024 = vmatpush3.bf16.msra.mxu1 %v1099_v59 }
 0x187   :  { %1029 = vmatprep.subr.bf16.mxu1 %v1330_v1 }
 0x23c   :  { %v353_v49 = vpop.f32.mrb[0].mxu1 }
 0x23d   :  { %v354_v51 = vadd.f32 %v881_v48, %v353_v49  ;;  %v987_v52 = vpop.f32.mrb[1].mxu1 }
 0x23e   :  { %v356_v53 = vpop.f32.mrb[2].mxu1 }
 0x23f   :  { %v359_v54 = vadd.f32 %v354_v51, %v242_v50  ;;  %v988_v55 = vpop.f32.mrb[3].mxu1  ;;  %v924_v50 = vld [vmem:[%s1606_s12] ss:$0 sm:$0xff] }
 0x241   :  { %v1549_v56 = vmax.f32 %v359_v54, 0.0 }
 0x243   :  { %v361_v57 = vpack.c.bf16 %v1549_v56, %v1549_v56 }
 0x245   :  { %1006 = vmatmul.mubr.bf16.vlgmr.msra.gmra.mrb[4].mxu0 %v361_v57 }
 0x246   :  { %729 = vmatprep.mubr.bf16.mxu0 %v1329_v0  ;;  %698 = vmatpush1.bf16.msra.mxu0 %v1100_v60  ;;  %v1111_v0 = vld [vmem:[#allocation11 + $0x34] ss:$8 sps:$4 sm:$0xff]  }
 0x247   :  { %699 = vmatprep.subr.bf16.mxu0 %v1105_v62 }
 0x24a   :  { %700 = vmatpush1.bf16.msra.mxu0 %v1103_v63 }
 0x24b   :  { %701 = vmatprep.subr.bf16.mxu0 %v1108_v2 }
 0x24e   :  { %702 = vmatpush1.bf16.msra.mxu0 %v1106_v3 }
 0x24f   :  { %703 = vmatprep.subr.bf16.mxu0 %v1111_v0 }
 0x252   :  { %704 = vmatpush1.bf16.msra.mxu0 %v1109_v4 }
 0x253   :  { %705 = vmatprep.subr.bf16.mxu0 %v1114_v5 }
 0x256   :  { %706 = vmatpush1.bf16.msra.mxu0 %v1112_v6 }
 0x257   :  { %707 = vmatprep.subr.bf16.mxu0 %v1117_v7 }
 0x25a   :  { %708 = vmatpush1.bf16.msra.mxu0 %v1115_v8 }
 0x25b   :  { %709 = vmatprep.subr.bf16.mxu0 %v1120_v17 }
 0x25e   :  { %710 = vmatpush1.bf16.msra.mxu0 %v1118_v18 }
 0x25f   :  { %711 = vmatprep.subr.bf16.mxu0 %v1123_v19 }
 0x262   :  { %712 = vmatpush1.bf16.msra.mxu0 %v1121_v20 }
 0x318   :  { %v467_v10 = vpop.f32.mrb[4].mxu0 }
 0x319   :  { %v468_v11 = vadd.f32 %v890_v9, %v467_v10  ;;  %v1007_v12 = vpop.f32.mrb[5].mxu0 }
 0x31a   :  { %v470_v13 = vpop.f32.mrb[6].mxu0 }
 0x31b   :  { %v473_v14 = vmax.f32 %v468_v11, 0.0  ;;  %v1008_v15 = vpop.f32.mrb[7].mxu0 }
 0x31d   :  { %v474_v16 = vpack.c.bf16 %v473_v14, %v473_v14 }
 0x31f   :  { %1026 = vmatmul.mubr.bf16.vlgmr.msra.gmra.mrb[4].mxu1 %v474_v16 }
 0x320   :  { %1045 = vmatprep.mubr.msk.bf16.mxu1 %vm1331_vm1, %v1330_v1  ;;  %1030 = vmatpush3.bf16.msra.mxu1 %v1124_v21 }
 0x321   :  { %1031 = vmatprep.subr.bf16.mxu1 %v1330_v1 }
 0x324   :  { %1032 = vmatpush3.bf16.msra.mxu1 %v1125_v22 }
 0x325   :  { %1033 = vmatprep.subr.bf16.mxu1 %v1330_v1 }
 0x328   :  { %1034 = vmatpush3.bf16.msra.mxu1 %v1126_v23 }
 0x329   :  { %1035 = vmatprep.subr.bf16.mxu1 %v1330_v1 }
 0x32c   :  { %1036 = vmatpush3.bf16.msra.mxu1 %v1127_v24 }
 0x32d   :  { %1037 = vmatprep.subr.bf16.mxu1 %v1330_v1 }
 0x330   :  { %1038 = vmatpush3.bf16.msra.mxu1 %v1128_v25 }
 0x331   :  { %1039 = vmatprep.subr.bf16.mxu1 %v1330_v1 }
 0x334   :  { %1040 = vmatpush3.bf16.msra.mxu1 %v1129_v26 }
 0x335   :  { %1041 = vmatprep.subr.bf16.mxu1 %v1330_v1 }
 0x338   :  { %1042 = vmatpush3.bf16.msra.mxu1 %v1130_v38 }
 0x339   :  { %1043 = vmatprep.subr.bf16.mxu1 %v1330_v1  ;;  %v614_v1 = vrot.slane %v605_v40, %v157_v46 }
 0x33c   :  { %1044 = vmatpush3.bf16.msra.mxu1 %v1131_v39 }
 0x3f2   :  { %v580_v30 = vpop.f32.mrb[4].mxu1 }
 0x3f3   :  { %v581_v31 = vadd.f32 %v899_v29, %v580_v30  ;;  %v1027_v32 = vpop.f32.mrb[5].mxu1 }
 0x3f4   :  { %v583_v33 = vpop.f32.mrb[6].mxu1 }
 0x3f5   :  { %v586_v34 = vadd.f32 %v581_v31, %v1549_v56  ;;  %v1028_v35 = vpop.f32.mrb[7].mxu1 }
 0x3f7   :  { %v587_v36 = vmax.f32 %v586_v34, 0.0 }
 0x3f9   :  { %v588_v37 = vpack.c.bf16 %v587_v36, %v587_v36 }
 0x3fb   :  { %730 = vmatmul.mubr.bf16.vlgmr.msra.gmra.mrb[8].mxu0 %v588_v37 }
 0x4ce   :  { %v731_v42 = vpop.f32.mrb[8].mxu0 }
 0x4cf   :  { %v732_v43 = vadd.f32 %v731_v42, %v610_v41  ;;  %v733_v44 = vpop.f32.mrb[9].mxu0 }
 0x4d0   :  { %v735_v45 = vpop.f32.mrb[10].mxu0  ;;  %v734_v52 = vadd.f32 %v733_v44, %v614_v1 }
 0x4d1   :  { %v738_v47 = vmax.f32 %v732_v43, 0.0  ;;  %v736_v48 = vpop.f32.mrb[11].mxu0 }
 0x4d3   :  { %v739_v49 = vpack.c.bf16 %v738_v47, %v738_v47 }
 0x4d5   :  { %1046 = vmatmul.mubr.bf16.vlgmr.msra.gmra.mrb[8].mxu1 %v739_v49 }
 0x5a8   :  { %v845_v51 = vpop.f32.mrb[8].mxu1 }
 0x5a9   :  { %v846_v53 = vadd.f32 %v924_v50, %v845_v51  ;;  %v1047_v54 = vpop.f32.mrb[9].mxu1 }
 0x5aa   :  { %v848_v28 = vpop.f32.mrb[10].mxu1 }
 0x5ab   :  { %v851_v55 = vadd.f32 %v846_v53, %v734_v52  ;;  %v1048_v56 = vpop.f32.mrb[11].mxu1 }
 0x5ad   :  { %v852_v57 = vmax.f32 %v851_v55, 0.0 }
 0x5af   :  { %853 = vst [vmem:[#allocation14] sm:$0xff] %v852_v57 }
 0x5b0   :  { %1297 = shalt.err (!%p1294_p4)
}
 0x5b1   :  { %s1298_s3 = scalar_lea.hbm %s1607_s13, 128 }
 0x5b2   :  { %p1299_p5 = scmp.ne.s32.totalorder %s1607_s13, %s1298_s3  ;;  %p1302_p6 = scmp.lt.u32.totalorder %s1298_s3, %s1607_s13 }
 0x5b4   :  { %p1304_p7 = pnand %p1302_p6, %p1299_p5 }
 0x5b6   :  { %1307 = shalt.err (!%p1304_p7)
}
 0x5b7   :  { %863 = dma.vmem_to_hbm [thread:$0]  %s861_s25, 128, %s1607_s13, [#allocation4]  }
 0x5b8   :  { %1316 = dma.done.wait [#allocation4], 128  }
 0x5b9   :  { %1317 = vsyncadd [#allocation4], 4294967168 }
 0x5ba   :  { %867 = vsyncpa [#allocation3], 1 }
 0x5bb   :  { %868 = vsyncpa [#allocation6], 1 }
 0x5bc   :  { %869 = vsyncpa [#allocation9], 1 }
 0x5bd   :  { %870 = vsyncpa [#allocation12], 1 }
 0x5be   :  { %871 = vsyncpa [#allocation4], 1 }

</bundles_post_ra>
